<compile_context>
chip_gen: v7x
topology: tpu7x:2x2x1
jax: 0.10.0
libtpu: 0.0.40
codegen_flags: <defaults>
</compile_context>

<pallas_src>
import jax
import jax.numpy as jnp
from jax.experimental import pallas as pl
from jax.experimental.pallas import tpu as pltpu

LANE = 128                     # vreg lane width (last dim)
ACC_ROWS = 32                  # accumulator rows -> 4 independent vreg chains
MAX_CHUNK_ROWS = 2048          # inner-loop chunk: 1 MiB f32 temps per operand
TARGET_BLOCK_BYTES = 8 << 20   # HBM bytes per operand per grid step (DMA block)
VMEM_LIMIT_BYTES = 48 << 20    # fits v7x (64 MiB phys); ample on v5e/v6e
_PAD_DISTANCE = 1.0e4          # softplus(-1e4) == 0 exactly in f32


def _make_bpr_kernel(*, total_rows, tile_rows, chunk_rows, acc_rows, needs_mask):
    """Builds the kernel body for a given static tiling configuration."""
    num_chunks = tile_rows // chunk_rows

    def kernel(pos_ref, neg_ref, out_ref, acc_ref):
        step = pl.program_id(0)

        @pl.when(step == 0)
        def _init():
            acc_ref[...] = jnp.zeros_like(acc_ref)

        if needs_mask:
            # Rows of this block that lie inside the real input.  Only the
            # last grid step can have rows_left < tile_rows (partial block:
            # the DMA leaves garbage in the tail rows of the VMEM buffer).
            rows_left = total_rows - step * tile_rows
            # Hoisted out of the chunk loop (JAX does not CSE broadcasts).
            row_iota = jax.lax.broadcasted_iota(
                jnp.int32, (chunk_rows, LANE), 0)

        def process_chunk(j, r0):
            # Hot path: VPU sub/abs/max/select + EUP exp/log, accumulated into
            # a small f32 vector accumulator.  No per-step XLU/scalar work.
            p = pos_ref[pl.ds(r0, chunk_rows), :].astype(jnp.float32)
            q = neg_ref[pl.ds(r0, chunk_rows), :].astype(jnp.float32)
            d = p - q
            if needs_mask:
                # Mask the out-of-bounds tail BEFORE the softplus so garbage
                # (possibly NaN/Inf) cannot propagate through exp/log.
                # softplus(-1e4) == 0 exactly -> masked rows contribute 0.
                valid = row_iota < (rows_left - j * chunk_rows)
                d = jnp.where(valid, d, _PAD_DISTANCE)
            # Stable softplus(-d): exp argument is always <= 0 (no overflow).
            # (log1p would be <=1 ulp/element better; kept as log(1+x) for
            #  guaranteed Mosaic lowering — negligible vs. the summed loss.)
            sp = jnp.maximum(-d, 0.0) + jnp.log(1.0 + jnp.exp(-jnp.abs(d)))
            acc_ref[...] += jnp.sum(sp.reshape(-1, acc_rows, LANE), axis=0)

        if num_chunks == 1:
            process_chunk(0, 0)
        else:
            def chunk_body(j, carry):
                process_chunk(j, pl.multiple_of(j * chunk_rows, chunk_rows))
                return carry
            jax.lax.fori_loop(0, num_chunks, chunk_body, 0)

        @pl.when(step == pl.num_programs(0) - 1)
        def _finalize():
            # Single cross-sublane/cross-lane reduce, straight to SMEM output.
            out_ref[0, 0] = jnp.sum(acc_ref[...])

    return kernel


def _round_up(x: int, m: int) -> int:
    return ((x + m - 1) // m) * m


def bpr_loss(pos_preds: jax.Array, neg_preds: jax.Array) -> jax.Array:
    """Pallas BPR loss: sum(log(1 + exp(-(pos - neg)))). Any shape, any size."""
    assert pos_preds.shape == neg_preds.shape
    n = int(pos_preds.size)
    if n == 0:                       # guard (review correctness concern)
        return jnp.zeros((), jnp.float32)

    # Keep sub-32-bit float inputs narrow (halves HBM traffic for this
    # bandwidth-bound kernel); upcast to f32 inside the kernel.
    dt = jnp.result_type(pos_preds.dtype, neg_preds.dtype)
    if dt in (jnp.bfloat16, jnp.float16):
        in_dtype, itemsize = dt, 2
    else:
        in_dtype, itemsize = jnp.float32, 4

    pos = pos_preds.reshape(-1).astype(in_dtype)
    neg = neg_preds.reshape(-1).astype(in_dtype)

    # Lane-dense (rows, 128) view.  When n is a multiple of 128 this is a pure
    # layout-preserving reshape -- no HBM copy (unlike the old full-array pad).
    # Only a non-128-aligned n pays a small pad-to-128 copy; the pad pair
    # (pos=+1e4, neg=0) makes padded elements contribute exactly 0.
    rem = n % LANE
    if rem:
        pad = LANE - rem
        pos = jnp.pad(pos, (0, pad), constant_values=_PAD_DISTANCE)
        neg = jnp.pad(neg, (0, pad), constant_values=0.0)
    rows = pos.shape[0] // LANE
    pos2d = pos.reshape(rows, LANE)
    neg2d = neg.reshape(rows, LANE)

    # Tile sizing by byte budget: same HBM bytes per grid step for f32/bf16/f16.
    if rows <= MAX_CHUNK_ROWS:
        # Small input: one full-array block (always legal), no partial blocks,
        # no masking, single chunk.
        chunk_rows = rows
        tile_rows = rows
        acc_rows = rows
    else:
        chunk_rows = MAX_CHUNK_ROWS
        acc_rows = ACC_ROWS
        budget_chunks = max(
            1, TARGET_BLOCK_BYTES // (chunk_rows * LANE * itemsize))
        # tile_rows <= rows so blocks never exceed the array; the last block
        # may still be partial (handled by the in-kernel row mask).
        chunks_per_block = max(1, min(budget_chunks, rows // chunk_rows))
        tile_rows = chunks_per_block * chunk_rows

    num_blocks = pl.cdiv(rows, tile_rows)
    needs_mask = (num_blocks * tile_rows != rows)

    kernel = _make_bpr_kernel(
        total_rows=rows, tile_rows=tile_rows, chunk_rows=chunk_rows,
        acc_rows=acc_rows, needs_mask=needs_mask)

    out = pl.pallas_call(
        kernel,
        out_shape=jax.ShapeDtypeStruct((1, 1), jnp.float32),
        grid_spec=pltpu.PrefetchScalarGridSpec(
            num_scalar_prefetch=0,
            grid=(num_blocks,),
            in_specs=[
                pl.BlockSpec((tile_rows, LANE), lambda i: (i, 0)),
                pl.BlockSpec((tile_rows, LANE), lambda i: (i, 0)),
            ],
            out_specs=pl.BlockSpec(
                (1, 1), lambda i: (0, 0), memory_space=pltpu.SMEM),
            scratch_shapes=[pltpu.VMEM((acc_rows, LANE), jnp.float32)],
        ),
        compiler_params=pltpu.CompilerParams(
            # Single grid axis carries the accumulator -> "arbitrary".
            # A true v7x 2-TensorCore split would use CORE_PARALLEL/core_map.
            dimension_semantics=("arbitrary",),
            vmem_limit_bytes=VMEM_LIMIT_BYTES,
        ),
    )(pos2d, neg2d)

    return out[0, 0]


if __name__ == "__main__":
    key = jax.random.PRNGKey(0)
    kp, kn = jax.random.split(key)
    B = 2048  # small batch of (pos, neg) prediction pairs
    pos_preds = jax.random.normal(kp, (B,), dtype=jnp.float32)
    neg_preds = jax.random.normal(kn, (B,), dtype=jnp.float32)

    loss = bpr_loss(pos_preds, neg_preds)
    loss = jax.block_until_ready(loss)

    # Reference: stable softplus form of sum(log(1 + exp(-(pos - neg)))).
    d = pos_preds - neg_preds
    ref = jnp.sum(jnp.maximum(-d, 0.0) + jnp.log1p(jnp.exp(-jnp.abs(d))))
    assert jnp.allclose(loss, ref, rtol=1e-5, atol=1e-4), (loss, ref)

    print("KERNEL_OK")
</pallas_src>

<mosaic_0001>
module attributes {stable_mosaic.version = 11 : i64} {
  func.func @kernel(%arg0: i32, %arg1: memref<16x128xf32, #tpu.memory_space<vmem>>, %arg2: memref<16x128xf32, #tpu.memory_space<vmem>>, %arg3: memref<1x1xf32, #tpu.memory_space<smem>>, %arg4: memref<16x128xf32, #tpu.memory_space<vmem>>) attributes {dimension_semantics = [#tpu.dimension_semantics<arbitrary>], iteration_bounds = array<i64: 1>, scalar_prefetch = 0 : i64, scratch_operands = 1 : i64, tpu.core_type = #tpu.core_type<tc>, window_params = [{transform_indices = @transform_0, window_bounds = array<i64: 16, 128>}, {transform_indices = @transform_1, window_bounds = array<i64: 16, 128>}, {transform_indices = @transform_2, window_bounds = array<i64: 1, 1>}]} {
    %c0_i32 = arith.constant 0 : i32
    %0 = arith.cmpi eq, %arg0, %c0_i32 : i32
    %1 = arith.extui %0 : i1 to i32
    %c0_i32_0 = arith.constant 0 : i32
    %2 = arith.cmpi ne, %1, %c0_i32_0 : i32
    scf.if %2 {
      %cst_14 = arith.constant 0.000000e+00 : f32
      %26 = vector.broadcast %cst_14 : f32 to vector<16x128xf32>
      %c0_15 = arith.constant 0 : index
      %c0_16 = arith.constant 0 : index
      %27 = vector.load %arg4[%c0_15, %c0_16] : memref<16x128xf32, #tpu.memory_space<vmem>>, vector<16x128xf32>
      tpu.vector_store %arg4[%c0_15, %c0_16], %26 {strides = array<i32>} : memref<16x128xf32, #tpu.memory_space<vmem>>, vector<16x128xf32>,
    } else {
    }
    %c0 = arith.constant 0 : index
    %c0_1 = arith.constant 0 : index
    %3 = vector.load %arg1[%c0, %c0_1] : memref<16x128xf32, #tpu.memory_space<vmem>>, vector<16x128xf32>
    %c0_2 = arith.constant 0 : index
    %c0_3 = arith.constant 0 : index
    %4 = vector.load %arg2[%c0_2, %c0_3] : memref<16x128xf32, #tpu.memory_space<vmem>>, vector<16x128xf32>
    %5 = arith.subf %3, %4 : vector<16x128xf32>
    %cst = arith.constant 0.000000e+00 : f32
    %6 = vector.broadcast %cst : f32 to vector<16x128xf32>
    %7 = arith.subf %6, %5 : vector<16x128xf32>
    %cst_4 = arith.constant 0.000000e+00 : f32
    %8 = vector.broadcast %cst_4 : f32 to vector<16x128xf32>
    %9 = arith.maximumf %7, %8 : vector<16x128xf32>
    %10 = math.absf %5 : vector<16x128xf32>
    %cst_5 = arith.constant 0.000000e+00 : f32
    %11 = vector.broadcast %cst_5 : f32 to vector<16x128xf32>
    %12 = arith.subf %11, %10 : vector<16x128xf32>
    %13 = math.exp %12 : vector<16x128xf32>
    %cst_6 = arith.constant 1.000000e+00 : f32
    %14 = vector.broadcast %cst_6 : f32 to vector<16x128xf32>
    %15 = arith.addf %14, %13 : vector<16x128xf32>
    %16 = math.log %15 : vector<16x128xf32>
    %17 = arith.addf %9, %16 : vector<16x128xf32>
    %c0_7 = arith.constant 0 : index
    %c0_8 = arith.constant 0 : index
    %18 = vector.load %arg4[%c0_7, %c0_8] : memref<16x128xf32, #tpu.memory_space<vmem>>, vector<16x128xf32>
    %19 = vector.shape_cast %17 : vector<16x128xf32> to vector<1x16x128xf32>
    %cst_9 = arith.constant dense<0.000000e+00> : vector<16x128xf32>
    %20 = vector.multi_reduction <add>, %19, %cst_9 [0] : vector<1x16x128xf32> to vector<16x128xf32>
    %21 = arith.addf %18, %20 : vector<16x128xf32>
    %c0_10 = arith.constant 0 : index
    %c0_11 = arith.constant 0 : index
    %22 = vector.load %arg4[%c0_10, %c0_11] : memref<16x128xf32, #tpu.memory_space<vmem>>, vector<16x128xf32>
    tpu.vector_store %arg4[%c0_10, %c0_11], %21 {strides = array<i32>} : memref<16x128xf32, #tpu.memory_space<vmem>>, vector<16x128xf32>,
    %c0_i32_12 = arith.constant 0 : i32
    %23 = arith.cmpi eq, %arg0, %c0_i32_12 : i32
    %24 = arith.extui %23 : i1 to i32
    %c0_i32_13 = arith.constant 0 : i32
    %25 = arith.cmpi ne, %24, %c0_i32_13 : i32
    scf.if %25 {
      %c0_14 = arith.constant 0 : index
      %c0_15 = arith.constant 0 : index
      %26 = vector.load %arg4[%c0_14, %c0_15] : memref<16x128xf32, #tpu.memory_space<vmem>>, vector<16x128xf32>
      %27 = vector.shape_cast %26 : vector<16x128xf32> to vector<1x16x128xf32>
      %cst_16 = arith.constant dense<0.000000e+00> : vector<1xf32>
      %28 = vector.multi_reduction <add>, %27, %cst_16 [1, 2] : vector<1x16x128xf32> to vector<1xf32>
      %29 = vector.shape_cast %28 : vector<1xf32> to vector<1x1x1xf32>
      %30 = vector.extract %29[0, 0, 0] : f32 from vector<1x1x1xf32>
      %c0_17 = arith.constant 0 : index
      %c0_18 = arith.constant 0 : index
      %31 = memref.load %arg3[%c0_17, %c0_18] : memref<1x1xf32, #tpu.memory_space<smem>>
      memref.store %30, %arg3[%c0_17, %c0_18] : memref<1x1xf32, #tpu.memory_space<smem>>
    } else {
    }
    return
  }
  func.func @transform_0(%arg0: i32) -> (i32, i32) {
    %c0_i32 = arith.constant 0 : i32
    %c0_i32_0 = arith.constant 0 : i32
    return %arg0, %c0_i32 : i32, i32
  }
  func.func @transform_1(%arg0: i32) -> (i32, i32) {
    %c0_i32 = arith.constant 0 : i32
    %c0_i32_0 = arith.constant 0 : i32
    return %arg0, %c0_i32 : i32, i32
  }
  func.func @transform_2(%arg0: i32) -> (i32, i32) {
    %c0_i32 = arith.constant 0 : i32
    %c0_i32_0 = arith.constant 0 : i32
    %c0_i32_1 = arith.constant 0 : i32
    return %c0_i32, %c0_i32_0 : i32, i32
  }
}

</mosaic_0001>

<bundles_post_ra>
// kernel: tpu_custom_call.1
= control target key start
LH: loop header
LB: loop body
LE: loop exit
PB: predicated region body
PF: predicated region fallthrough
CT: control target
= control target key end

     0   :  { %7 = vsyncpa [#allocation4], 0  ;;  %s243_s0 = inlined_call_operand.hbm [shape: f32[16,128], index: 0, kind: input, shape index: {}]   ;;  %s244_s1 = inlined_call_operand.hbm [shape: f32[16,128], index: 1, kind: input, shape index: {}]   ;;  %s245_s2 = inlined_call_operand.hbm [shape: f32[1,1], index: 2, kind: output, shape index: {}]  }
   0x1   :  { %8 = vsyncpa [#allocation7], 0 }
   0x2   :  { %9 = vsyncpa [#allocation5], 0  ;;  %s187_s9 = smov [#allocation3]   ;;  %s127_s13 = scalar_lea.hbm %s243_s0, 256 }
   0x3   :  { %s15_s10 = sshll.u32 %s187_s9, 4  ;;  %p128_p0 = scmp.ne.s32.totalorder %s243_s0, %s127_s13  ;;  %s16_s10 = int_to_ptr.vmem [resolvable:$true] %s15_s10 }
   0x4   :  { %p131_p1 = scmp.lt.u32.totalorder %s127_s13, %s243_s0 }
   0x6   :  { %p133_p2 = pnand %p131_p1, %p128_p0 }
   0x8   :  { %136 = shalt.err (!%p133_p2)
}
   0x9   :  { %s137_s18 = scalar_lea.vmem %s16_s10, 256  ;;  %p142_p4 = scmp.lt.s32.totalorder %s16_s10, %s16_s10 }
   0xa   :  { %p138_p3 = scmp.ne.s32.totalorder %s16_s10, %s137_s18  ;;  %p143_p5 = scmp.lt.s32.totalorder %s137_s18, %s137_s18 }
   0xc   :  { %p144_p6 = por %p143_p5, %p142_p4 }
   0xe   :  { %p145_p7 = pnand %p144_p6, %p138_p3 }
  0x10   :  { %148 = shalt.err (!%p145_p7)
}
  0x11   :  { %s188_s19 = smov 128   ;;  %s189_s20 = smov 8  }
  0x12   :  { %21 = dma.hbm_to_vmem [thread:$0]  %s243_s0, 256, %s16_s10, [#allocation4], %s188_s19, %s188_s19, %s189_s20  }
  0x13   :  { %s190_s23 = smov [#allocation6]   ;;  %s149_s27 = scalar_lea.hbm %s244_s1, 256 }
  0x14   :  { %s27_s24 = sshll.u32 %s190_s23, 4  ;;  %p150_p8 = scmp.ne.s32.totalorder %s244_s1, %s149_s27  ;;  %s28_s24 = int_to_ptr.vmem [resolvable:$true] %s27_s24 }
  0x15   :  { %p153_p9 = scmp.lt.u32.totalorder %s149_s27, %s244_s1 }
  0x17   :  { %p155_p10 = pnand %p153_p9, %p150_p8 }
  0x19   :  { %158 = shalt.err (!%p155_p10)
}
  0x1a   :  { %s159_s4 = scalar_lea.vmem %s28_s24, 256  ;;  %p164_p12 = scmp.lt.s32.totalorder %s28_s24, %s28_s24 }
  0x1b   :  { %p160_p11 = scmp.ne.s32.totalorder %s28_s24, %s159_s4  ;;  %p165_p13 = scmp.lt.s32.totalorder %s159_s4, %s159_s4 }
  0x1d   :  { %p166_p0 = por %p165_p13, %p164_p12 }
  0x1f   :  { %p167_p1 = pnand %p166_p0, %p160_p11 }
  0x21   :  { %170 = shalt.err (!%p167_p1)
}
  0x22   :  { %33 = dma.hbm_to_vmem [thread:$0]  %s244_s1, 256, %s28_s24, [#allocation7], %s188_s19, %s188_s19, %s189_s20  }
  0x23   :  { %181 = dma.done.wait [#allocation4], 256  }
  0x24   :  { %182 = vsyncadd [#allocation4], 4294967040 }
  0x25   :  { %183 = dma.done.wait [#allocation7], 256  }
  0x26   :  { %184 = vsyncadd [#allocation7], 4294967040  ;;  %v46_v0 = vld [vmem:[#allocation3] sm:$0xff]  ;;  %v47_v1 = vld [vmem:[#allocation3 + $0x8] sm:$0xff]  ;;  %s171_s8 = scalar_lea.hbm %s245_s2, 16 }
  0x27   :  { %v48_v2 = vld [vmem:[#allocation6] sm:$0xff]  ;;  %v49_v3 = vld [vmem:[#allocation6 + $0x8] sm:$0xff]  ;;  %p172_p2 = scmp.ne.s32.totalorder %s245_s2, %s171_s8  ;;  %p175_p3 = scmp.lt.u32.totalorder %s171_s8, %s245_s2 }
  0x28   :  { %v50_v4 = vsub.f32 %v46_v0, %v48_v2  ;;  %v51_v5 = vsub.f32 %v47_v1, %v49_v3 }
  0x29   :  { %p177_p4 = pnand %p175_p3, %p172_p2 }
  0x2a   :  { %v56_v6 = vand.u32 2147483647, %v50_v4  ;;  %v57_v7 = vand.u32 2147483647, %v51_v5  ;;  %v52_v16 = vsub.f32 0.0, %v50_v4  ;;  %v53_v17 = vsub.f32 0.0, %v51_v5 }
  0x2c   :  { %v58_v8 = vsub.f32 0.0, %v56_v6  ;;  %v59_v9 = vsub.f32 0.0, %v57_v7  ;;  %v54_v18 = vmax.f32 %v52_v16, 0.0  ;;  %v55_v20 = vmax.f32 %v53_v17, 0.0 }
  0x2e   :  { %v60_v10 = vmul.f32 1.442695, %v58_v8  ;;  %v62_v11 = vmul.f32 1.442695, %v59_v9 }
  0x30   :  { %119 = vpow2.f32 %v60_v10 }
  0x31   :  { %121 = vpow2.f32 %v62_v11 }
  0x3a   :  { %v120_v12 = vpop.eup %119 }
  0x3b   :  { %v122_v13 = vpop.eup %121  ;;  %v64_v14 = vadd.f32 1.0, %v120_v12 }
  0x3c   :  { %v65_v15 = vadd.f32 1.0, %v122_v13 }
  0x3d   :  { %123 = vlog2.f32 %v64_v14 }
  0x3e   :  { %125 = vlog2.f32 %v65_v15 }
  0x47   :  { %v124_v19 = vpop.eup %123 }
  0x48   :  { %v126_v21 = vpop.eup %125  ;;  %v67_v22 = vmul.f32 0.6931472, %v124_v19 }
  0x49   :  { %v69_v23 = vmul.f32 0.6931472, %v126_v21 }
  0x4a   :  { %v70_v24 = vadd.f32 %v67_v22, %v54_v18 }
  0x4b   :  { %v71_v25 = vadd.f32 %v69_v23, %v55_v20 }
  0x4d   :  { %v85_v26 = vadd.f32 %v71_v25, %v70_v24 }
  0x4f   :  { %86 = vadd.xlane.f32.xlu0 %v85_v26 }
  0xdc   :  { %v87_v27 = vpop.xlane.xlu0 %86 }
  0xdd   :  { %v88_v28 = vrot.slane %v87_v27, 4 }
  0xdf   :  { %v89_v29 = vadd.f32 %v88_v28, %v87_v27 }
  0xe1   :  { %v90_v30 = vrot.slane %v89_v29, 2 }
  0xe3   :  { %v91_v31 = vadd.f32 %v90_v30, %v89_v29 }
  0xe5   :  { %v92_v32 = vrot.slane %v91_v31, 1 }
  0xe7   :  { %v93_v33 = vadd.f32 %v92_v32, %v91_v31 }
  0xe9   :  { %112 = vpush %v93_v33 }
 0x11a   :  { %s113_s1 = spop %112 }
 0x11b   :  { %96 = sst [smem:[#allocation8]] %s113_s1 }
 0x11c   :  { %180 = shalt.err (!%p177_p4)
}
 0x11d   :  { %s191_s13 = smov [#allocation8]  }
 0x11e   :  { %104 = dma.smem_to_hbm %s191_s13, 16, %s245_s2, [#allocation5]  }
 0x11f   :  { %185 = dma.done.wait [#allocation5], 16  }
 0x120   :  { %186 = vsyncadd [#allocation5], 4294967280 }
 0x121   :  { %108 = sfence }
 0x122   :  { %109 = vsyncpa [#allocation4], 1 }
 0x123   :  { %110 = vsyncpa [#allocation7], 1 }
 0x124   :  { %111 = vsyncpa [#allocation5], 1 }

</bundles_post_ra>
